<compile_context>
chip_gen: v7x
topology: tpu7x:2x2x1
jax: 0.10.0
libtpu: 0.0.40
codegen_flags: <defaults>
</compile_context>

<pallas_src>
import math

import jax
import jax.numpy as jnp
from jax.experimental import pallas as pl
from jax.experimental.pallas import tpu as pltpu


# ----------------------------------------------------------------------------
# helpers
# ----------------------------------------------------------------------------
def _round_up(n, m):
    return ((n + m - 1) // m) * m


def _pick_tile(dim, target, align):
    """Largest tile <= target that is the full dim or an align-multiple dividing dim."""
    if dim <= target:
        return dim
    t = (target // align) * align
    while t >= align:
        if dim % t == 0:
            return t
        t -= align
    # TODO(synk): pad ragged M/N/K instead of falling back to a single huge block.
    return dim


def _pad_out_dim(w_t, b, align=128):
    """Pad the output (N) dim of a pre-transposed (K, N) weight + bias to a
    multiple of `align` so kernel stores are lane-dense (unmasked vst)."""
    K, N = w_t.shape
    Np = _round_up(N, align)
    if Np != N:
        w_t = jnp.pad(w_t, ((0, 0), (0, Np - N)))
        b = jnp.pad(b, (0, Np - N))
    return w_t, b


# ----------------------------------------------------------------------------
# Kernel 1: tiled dense linear layer  y = x @ W + b   (bf16 MXU, f32 accumulate)
# ----------------------------------------------------------------------------
def _linear_kernel(x_ref, w_ref, b_ref, o_ref):
    k = pl.program_id(2)
    part = jnp.dot(
        x_ref[...].astype(jnp.bfloat16),
        w_ref[...].astype(jnp.bfloat16),
        preferred_element_type=jnp.float32,
    )

    @pl.when(k == 0)
    def _():
        # bias added exactly once; o_ref is f32 and resident across the k axis,
        # so accumulate in place (no separate VMEM acc scratch).
        o_ref[...] = part + b_ref[...]

    @pl.when(k != 0)
    def _():
        o_ref[...] += part


def pallas_linear(x2d, w_kn, bias, *, tm_target=512, tn_target=512, tk_target=512):
    """x2d: (M, K) f32, w_kn: (K, N) f32 (pre-transposed), bias: (N,) -> (M, N) f32."""
    M, K = x2d.shape
    N = w_kn.shape[1]
    tm = _pick_tile(M, tm_target, 8)
    tn = _pick_tile(N, tn_target, 128)
    tk = _pick_tile(K, tk_target, 128)
    grid = (M // tm, N // tn, K // tk)
    return pl.pallas_call(
        _linear_kernel,
        out_shape=jax.ShapeDtypeStruct((M, N), jnp.float32),
        grid=grid,
        in_specs=[
            pl.BlockSpec((tm, tk), lambda i, j, k: (i, k)),
            pl.BlockSpec((tk, tn), lambda i, j, k: (k, j)),
            pl.BlockSpec((1, tn), lambda i, j, k: (0, j)),
        ],
        out_specs=pl.BlockSpec((tm, tn), lambda i, j, k: (i, j)),
        compiler_params=pltpu.CompilerParams(
            dimension_semantics=("parallel", "parallel", "arbitrary"),
            vmem_limit_bytes=64 * 1024 * 1024,
        ),
    )(x2d, w_kn, bias.reshape(1, N))


# ----------------------------------------------------------------------------
# Kernel 2: flash-style scaled-dot-product attention.
# Grid (B, H, Sq/tq, Sk/tk); online softmax with m/l/acc scratch; also emits
# the scaled pre-softmax scores per tile (matches torch attention_mech return).
# ----------------------------------------------------------------------------
def _flash_attn_kernel(q_ref, k_ref, v_ref, scores_ref, ctx_ref, m_sc, l_sc, acc_sc):
    ki = pl.program_id(3)

    @pl.when(ki == 0)
    def _():
        m_sc[...] = jnp.full_like(m_sc, -jnp.inf)
        l_sc[...] = jnp.zeros_like(l_sc)
        acc_sc[...] = jnp.zeros_like(acc_sc)

    d_k = k_ref.shape[-1]
    # fold 1/sqrt(d_k) into q (tq*d elems) instead of scaling tq*tk scores
    q = (q_ref[...] * jnp.float32(1.0 / math.sqrt(d_k))).astype(jnp.bfloat16)
    k = k_ref[...].astype(jnp.bfloat16)
    # q @ k.T without materializing a transpose; bf16 MXU operands, f32 acc.
    s = jax.lax.dot_general(
        q, k, (((1,), (1,)), ((), ())), preferred_element_type=jnp.float32
    )
    scores_ref[...] = s  # pre-softmax scaled scores (torch return value)

    # online softmax (f32 elementwise / exp — keep off bf16 for v5e VPU/EUP)
    m_prev = m_sc[...]
    m_new = jnp.maximum(m_prev, jnp.max(s, axis=-1, keepdims=True))
    alpha = jnp.exp(m_prev - m_new)
    p = jnp.exp(s - m_new)
    l_sc[...] = alpha * l_sc[...] + jnp.sum(p, axis=-1, keepdims=True)
    pv = jnp.dot(
        p.astype(jnp.bfloat16),
        v_ref[...].astype(jnp.bfloat16),
        preferred_element_type=jnp.float32,
    )
    acc_sc[...] = alpha * acc_sc[...] + pv
    m_sc[...] = m_new

    @pl.when(ki == pl.num_programs(3) - 1)
    def _():
        ctx_ref[...] = acc_sc[...] * pl.reciprocal(l_sc[...], approx=True)


def pallas_flash_attention(q4, k4, v4, *, tq_target=256, tk_target=512):
    """q4: (B,H,Sq,dq), k4: (B,H,Sk,dk), v4: (B,H,Sk,dv) -> (scores, ctx)."""
    B, H, Sq, dq = q4.shape
    Sk, dk = k4.shape[2], k4.shape[3]
    dv = v4.shape[3]
    tq = _pick_tile(Sq, tq_target, 8)
    tk = _pick_tile(Sk, tk_target, 128)
    grid = (B, H, Sq // tq, Sk // tk)
    scores, ctx = pl.pallas_call(
        _flash_attn_kernel,
        out_shape=(
            jax.ShapeDtypeStruct((B, H, Sq, Sk), jnp.float32),
            jax.ShapeDtypeStruct((B, H, Sq, dv), jnp.float32),
        ),
        grid=grid,
        in_specs=[
            pl.BlockSpec((None, None, tq, dq), lambda b, h, qi, ki: (b, h, qi, 0)),
            pl.BlockSpec((None, None, tk, dk), lambda b, h, qi, ki: (b, h, ki, 0)),
            pl.BlockSpec((None, None, tk, dv), lambda b, h, qi, ki: (b, h, ki, 0)),
        ],
        out_specs=(
            pl.BlockSpec((None, None, tq, tk), lambda b, h, qi, ki: (b, h, qi, ki)),
            pl.BlockSpec((None, None, tq, dv), lambda b, h, qi, ki: (b, h, qi, 0)),
        ),
        scratch_shapes=[
            pltpu.VMEM((tq, 1), jnp.float32),   # running max m
            pltpu.VMEM((tq, 1), jnp.float32),   # running denom l
            pltpu.VMEM((tq, dv), jnp.float32),  # running context acc
        ],
        compiler_params=pltpu.CompilerParams(
            dimension_semantics=("parallel", "parallel", "parallel", "arbitrary"),
            vmem_limit_bytes=64 * 1024 * 1024,
        ),
    )(q4, k4, v4)
    return scores, ctx


# ----------------------------------------------------------------------------
# Parameter prep (ONCE, outside forward): fuse QKV / KV, transpose to (K, N),
# pad N to a multiple of 128 for lane-dense stores.
# ----------------------------------------------------------------------------
def prepare_params(raw):
    w_qkv, b_qkv = _pad_out_dim(
        jnp.concatenate([raw["wq"], raw["wk"], raw["wv"]], axis=0).T,
        jnp.concatenate([raw["bq"], raw["bk"], raw["bv"]], axis=0),
    )
    wq_t, bq_p = _pad_out_dim(raw["wq"].T, raw["bq"])
    w_kv, b_kv = _pad_out_dim(
        jnp.concatenate([raw["wk"], raw["wv"]], axis=0).T,
        jnp.concatenate([raw["bk"], raw["bv"]], axis=0),
    )
    wo_t, bo_p = _pad_out_dim(raw["wo"].T, raw["bo"])
    return dict(
        n_heads=raw["n_heads"],
        hd=raw["wq"].shape[0],      # qkv_dim * n_heads
        e_out=raw["wo"].shape[0],   # embedding_dim
        w_qkv=w_qkv, b_qkv=b_qkv,
        wq=wq_t, bq=bq_p,
        w_kv=w_kv, b_kv=b_kv,
        wo=wo_t, bo=bo_p,
    )


# ----------------------------------------------------------------------------
# Module forward (glue in plain JAX; matmuls / softmax live in the kernels)
# ----------------------------------------------------------------------------
def multi_attention_forward(params, self_embedding, cross_embedding=None, mask=None):
    if mask is not None:
        # TODO(synk): masked_fill(mask == 0, -1e9) must be applied to the QK
        # tile inside _flash_attn_kernel (pre-softmax); not implemented here.
        raise NotImplementedError("mask is not supported in this synthetic kernel")

    H = params["n_heads"]
    HD = params["hd"]
    B, Sq, E = self_embedding.shape
    x2d = self_embedding.reshape(B * Sq, E)

    if cross_embedding is None:
        # Fused QKV projection: one pallas_call, activation read from HBM once.
        qkv = pallas_linear(x2d, params["w_qkv"], params["b_qkv"])   # (B*Sq, pad(3*HD))
        q = qkv[:, 0:HD].reshape(B, Sq, HD)
        k = qkv[:, HD:2 * HD].reshape(B, Sq, HD)
        v = qkv[:, 2 * HD:3 * HD].reshape(B, Sq, HD)
        Skv = Sq
    else:
        Bc, Skv, Ec = cross_embedding.shape
        c2d = cross_embedding.reshape(Bc * Skv, Ec)
        q = pallas_linear(x2d, params["wq"], params["bq"])[:, :HD].reshape(B, Sq, HD)
        kv = pallas_linear(c2d, params["w_kv"], params["b_kv"])      # (Bc*Skv, pad(2*HD))
        k = kv[:, 0:HD].reshape(Bc, Skv, HD)
        v = kv[:, HD:2 * HD].reshape(Bc, Skv, HD)

    dq, dk, dv = q.shape[-1] // H, k.shape[-1] // H, v.shape[-1] // H
    # NOTE: exactly torch's .reshape(B, H, S, d) — a flat reinterpretation that
    # interleaves sequence and head data (NOT a split-heads transpose).
    q4 = q.reshape(B, H, Sq, dq)
    k4 = k.reshape(B, H, Skv, dk)
    v4 = v.reshape(B, H, Skv, dv)

    scores, ctx = pallas_flash_attention(q4, k4, v4)

    out2d = ctx.reshape(B * Sq, H * dv)
    E_out = params["e_out"]
    out = pallas_linear(out2d, params["wo"], params["bo"])[:, :E_out].reshape(B, Sq, E_out)
    return out, scores


# ----------------------------------------------------------------------------
# Pure-JAX reference (for correctness check only)
# ----------------------------------------------------------------------------
def _ref_forward(raw, x):
    def lin(a, w, b):
        return a @ w.T + b

    H = raw["n_heads"]
    q = lin(x, raw["wq"], raw["bq"])
    k = lin(x, raw["wk"], raw["bk"])
    v = lin(x, raw["wv"], raw["bv"])
    B, S, HD = q.shape
    d = HD // H
    q4, k4, v4 = (t.reshape(B, H, S, d) for t in (q, k, v))
    scores = jnp.einsum("bhqd,bhkd->bhqk", q4, k4) / math.sqrt(d)
    p = jax.nn.softmax(scores, axis=-1)
    ctx = jnp.einsum("bhqk,bhkd->bhqd", p, v4).reshape(B, S, HD)
    out = lin(ctx, raw["wo"], raw["bo"])
    return out, scores


if __name__ == "__main__":
    # embedding_dim must equal qkv_dim * n_heads for output_linear(E, E).
    B, S = 2, 8
    n_heads, qkv_dim = 4, 8
    embedding_dim = qkv_dim * n_heads  # 32

    key = jax.random.PRNGKey(0)
    ks = jax.random.split(key, 9)

    def linear_init(kw, kb, out_f, in_f):
        bound = 1.0 / math.sqrt(in_f)
        w = jax.random.uniform(kw, (out_f, in_f), jnp.float32, -bound, bound)
        b = jax.random.uniform(kb, (out_f,), jnp.float32, -bound, bound)
        return w, b

    wq, bq = linear_init(ks[0], ks[1], qkv_dim * n_heads, embedding_dim)
    wk, bk = linear_init(ks[2], ks[3], qkv_dim * n_heads, embedding_dim)
    wv, bv = linear_init(ks[4], ks[5], qkv_dim * n_heads, embedding_dim)
    wo, bo = linear_init(ks[6], ks[7], embedding_dim, embedding_dim)
    raw_params = dict(
        n_heads=n_heads,
        wq=wq, bq=bq, wk=wk, bk=bk, wv=wv, bv=bv, wo=wo, bo=bo,
    )
    params = prepare_params(raw_params)   # fuse / transpose / pad ONCE

    x = jax.random.normal(ks[8], (B, S, embedding_dim), jnp.float32)

    out, attn = multi_attention_forward(params, x)
    out, attn = jax.block_until_ready((out, attn))

    out_ref, attn_ref = _ref_forward(raw_params, x)
    # bf16 MXU operands + approximate softmax reciprocal -> relaxed tolerances
    assert jnp.allclose(attn, attn_ref, atol=3e-2, rtol=3e-2)
    assert jnp.allclose(out, out_ref, atol=5e-2, rtol=5e-2)

    print("KERNEL_OK")
</pallas_src>

<mosaic_0001>
module attributes {stable_mosaic.version = 11 : i64} {
  func.func @_linear_kernel(%arg0: i32, %arg1: i32, %arg2: i32, %arg3: memref<16x32xf32, #tpu.memory_space<vmem>>, %arg4: memref<32x128xf32, #tpu.memory_space<vmem>>, %arg5: memref<1x128xf32, #tpu.memory_space<vmem>>, %arg6: memref<16x128xf32, #tpu.memory_space<vmem>>) attributes {dimension_semantics = [#tpu.dimension_semantics<parallel>, #tpu.dimension_semantics<parallel>, #tpu.dimension_semantics<arbitrary>], iteration_bounds = array<i64: 1, 1, 1>, scalar_prefetch = 0 : i64, scratch_operands = 0 : i64, tpu.core_type = #tpu.core_type<tc>, window_params = [{transform_indices = @transform_0, window_bounds = array<i64: 16, 32>}, {transform_indices = @transform_1, window_bounds = array<i64: 32, 128>}, {transform_indices = @transform_2, window_bounds = array<i64: 1, 128>}, {transform_indices = @transform_3, window_bounds = array<i64: 16, 128>}]} {
    %c0 = arith.constant 0 : index
    %c0_0 = arith.constant 0 : index
    %0 = vector.load %arg3[%c0, %c0_0] : memref<16x32xf32, #tpu.memory_space<vmem>>, vector<16x32xf32>
    %1 = arith.truncf %0 : vector<16x32xf32> to vector<16x32xbf16>
    %c0_1 = arith.constant 0 : index
    %c0_2 = arith.constant 0 : index
    %2 = vector.load %arg4[%c0_1, %c0_2] : memref<32x128xf32, #tpu.memory_space<vmem>>, vector<32x128xf32>
    %3 = arith.truncf %2 : vector<32x128xf32> to vector<32x128xbf16>
    %cst = arith.constant dense<0.000000e+00> : vector<16x128xf32>
    %4 = tpu.matmul %1, %3, %cst {dimension_numbers = #tpu.dot_dimension_numbers<[1], [0], [0], [1], [0, 0, 1, 1], [], []>} : vector<16x32xbf16>, vector<32x128xbf16>, vector<16x128xf32> -> vector<16x128xf32>
    %c0_i32 = arith.constant 0 : i32
    %5 = arith.cmpi eq, %arg2, %c0_i32 : i32
    %6 = arith.extui %5 : i1 to i32
    %c0_i32_3 = arith.constant 0 : i32
    %7 = arith.cmpi ne, %6, %c0_i32_3 : i32
    scf.if %7 {
      %c0_6 = arith.constant 0 : index
      %c0_7 = arith.constant 0 : index
      %11 = vector.load %arg5[%c0_6, %c0_7] : memref<1x128xf32, #tpu.memory_space<vmem>>, vector<1x128xf32>
      %12 = vector.broadcast %11 : vector<1x128xf32> to vector<16x128xf32>
      %13 = arith.addf %4, %12 : vector<16x128xf32>
      %c0_8 = arith.constant 0 : index
      %c0_9 = arith.constant 0 : index
      %14 = vector.load %arg6[%c0_8, %c0_9] : memref<16x128xf32, #tpu.memory_space<vmem>>, vector<16x128xf32>
      tpu.vector_store %arg6[%c0_8, %c0_9], %13 {strides = array<i32>} : memref<16x128xf32, #tpu.memory_space<vmem>>, vector<16x128xf32>,
    } else {
    }
    %c0_i32_4 = arith.constant 0 : i32
    %8 = arith.cmpi ne, %arg2, %c0_i32_4 : i32
    %9 = arith.extui %8 : i1 to i32
    %c0_i32_5 = arith.constant 0 : i32
    %10 = arith.cmpi ne, %9, %c0_i32_5 : i32
    scf.if %10 {
      %c0_6 = arith.constant 0 : index
      %c0_7 = arith.constant 0 : index
      %11 = vector.load %arg6[%c0_6, %c0_7] : memref<16x128xf32, #tpu.memory_space<vmem>>, vector<16x128xf32>
      %12 = arith.addf %11, %4 : vector<16x128xf32>
      %c0_8 = arith.constant 0 : index
      %c0_9 = arith.constant 0 : index
      %13 = vector.load %arg6[%c0_8, %c0_9] : memref<16x128xf32, #tpu.memory_space<vmem>>, vector<16x128xf32>
      tpu.vector_store %arg6[%c0_8, %c0_9], %12 {strides = array<i32>} : memref<16x128xf32, #tpu.memory_space<vmem>>, vector<16x128xf32>,
    } else {
    }
    return
  }
  func.func @transform_0(%arg0: i32, %arg1: i32, %arg2: i32) -> (i32, i32) {
    %c0_i32 = arith.constant 0 : i32
    return %arg0, %arg2 : i32, i32
  }
  func.func @transform_1(%arg0: i32, %arg1: i32, %arg2: i32) -> (i32, i32) {
    %c0_i32 = arith.constant 0 : i32
    return %arg2, %arg1 : i32, i32
  }
  func.func @transform_2(%arg0: i32, %arg1: i32, %arg2: i32) -> (i32, i32) {
    %c0_i32 = arith.constant 0 : i32
    %c0_i32_0 = arith.constant 0 : i32
    return %c0_i32, %arg1 : i32, i32
  }
  func.func @transform_3(%arg0: i32, %arg1: i32, %arg2: i32) -> (i32, i32) {
    %c0_i32 = arith.constant 0 : i32
    return %arg0, %arg1 : i32, i32
  }
}

</mosaic_0001>

<bundles_post_ra>
// kernel: tpu_custom_call.1
= control target key start
LH: loop header
LB: loop body
LE: loop exit
PB: predicated region body
PF: predicated region fallthrough
CT: control target
= control target key end

     0   :  { %8 = vsyncpa [#allocation3], 0  ;;  %s359_s0 = inlined_call_operand.hbm [shape: f32[16,32], index: 0, kind: input, shape index: {}]   ;;  %s360_s1 = inlined_call_operand.hbm [shape: f32[32,128], index: 1, kind: input, shape index: {}]   ;;  %s361_s2 = inlined_call_operand.hbm [shape: f32[1,128], index: 2, kind: input, shape index: {}]   ;;  %s362_s3 = inlined_call_operand.hbm [shape: f32[16,128], index: 3, kind: output, shape index: {}]  }
   0x1   :  { %9 = vsyncpa [#allocation6], 0 }
   0x2   :  { %10 = vsyncpa [#allocation4], 0  ;;  %s267_s12 = smov [#allocation5]   ;;  %s268_s14 = smov [#allocation2]  }
   0x3   :  { %s28_s13 = sshll.u32 %s267_s12, 4  ;;  %s16_s15 = sshll.u32 %s268_s14, 4  ;;  %s29_s13 = int_to_ptr.vmem [resolvable:$true] %s28_s13  ;;  %s295_s15 = int_to_ptr.vmem [resolvable:$true] %s16_s15 }
   0x4   :  { %s173_s18 = scalar_lea.hbm %s360_s1, 512 }
   0x5   :  { %p174_p0 = scmp.ne.s32.totalorder %s360_s1, %s173_s18  ;;  %p177_p1 = scmp.lt.u32.totalorder %s173_s18, %s360_s1 }
   0x7   :  { %p179_p2 = pnand %p177_p1, %p174_p0 }
   0x9   :  { %182 = shalt.err (!%p179_p2)
}
   0xa   :  { %s183_s23 = scalar_lea.vmem %s29_s13, 512  ;;  %p188_p4 = scmp.lt.s32.totalorder %s29_s13, %s29_s13 }
   0xb   :  { %p184_p3 = scmp.ne.s32.totalorder %s29_s13, %s183_s23  ;;  %p189_p5 = scmp.lt.s32.totalorder %s183_s23, %s183_s23 }
   0xd   :  { %p190_p6 = por %p189_p5, %p188_p4 }
   0xf   :  { %p191_p7 = pnand %p190_p6, %p184_p3 }
  0x11   :  { %194 = shalt.err (!%p191_p7)
}
  0x12   :  { %s269_s24 = smov 128   ;;  %s270_s25 = smov 8  }
  0x13   :  { %34 = dma.hbm_to_vmem [thread:$0]  %s360_s1, 512, %s29_s13, [#allocation6], %s269_s24, %s269_s24, %s270_s25  }
  0x14   :  { %s195_s30 = scalar_lea.hbm %s359_s0, 256 }
  0x15   :  { %p196_p8 = scmp.ne.s32.totalorder %s359_s0, %s195_s30  ;;  %p199_p9 = scmp.lt.u32.totalorder %s195_s30, %s359_s0 }
  0x17   :  { %p201_p10 = pnand %p199_p9, %p196_p8 }
  0x19   :  { %204 = shalt.err (!%p201_p10)
}
  0x1a   :  { %s205_s8 = scalar_lea.vmem %s295_s15, 256  ;;  %p210_p12 = scmp.lt.s32.totalorder %s295_s15, %s295_s15 }
  0x1b   :  { %p206_p11 = scmp.ne.s32.totalorder %s295_s15, %s205_s8  ;;  %p211_p13 = scmp.lt.s32.totalorder %s205_s8, %s205_s8 }
  0x1d   :  { %p212_p0 = por %p211_p13, %p210_p12 }
  0x1f   :  { %p213_p1 = pnand %p212_p0, %p206_p11 }
  0x21   :  { %216 = shalt.err (!%p213_p1)
}
  0x22   :  { %22 = dma.hbm_to_vmem [thread:$0]  %s359_s0, 256, %s295_s15, [#allocation3], %s269_s24, %s269_s24, %s270_s25  }
  0x23   :  { %s271_s10 = smov [#allocation7]   ;;  %s217_s14 = scalar_lea.hbm %s361_s2, 16 }
  0x24   :  { %s41_s11 = sshll.u32 %s271_s10, 4  ;;  %p218_p2 = scmp.ne.s32.totalorder %s361_s2, %s217_s14  ;;  %s42_s11 = int_to_ptr.vmem [resolvable:$true] %s41_s11 }
  0x25   :  { %p221_p3 = scmp.lt.u32.totalorder %s217_s14, %s361_s2 }
  0x27   :  { %p223_p4 = pnand %p221_p3, %p218_p2 }
  0x29   :  { %226 = shalt.err (!%p223_p4)
}
  0x2a   :  { %s227_s20 = scalar_lea.vmem %s42_s11, 16  ;;  %s231_s0 = scalar_lea.vmem %s42_s11, 32 }
  0x2b   :  { %p228_p5 = scmp.ne.s32.totalorder %s42_s11, %s227_s20  ;;  %p232_p6 = scmp.lt.s32.totalorder %s42_s11, %s42_s11 }
  0x2c   :  { %p233_p7 = scmp.lt.s32.totalorder %s231_s0, %s227_s20 }
  0x2e   :  { %p234_p8 = por %p233_p7, %p232_p6 }
  0x30   :  { %p235_p9 = pnand %p234_p8, %p228_p5 }
  0x32   :  { %238 = shalt.err (!%p235_p9)
}
  0x33   :  { %44 = dma.hbm_to_vmem [thread:$0]  %s361_s2, 16, %s42_s11, [#allocation6]  }
  0x34   :  { %261 = dma.done.wait [#allocation3], 256  }
  0x35   :  { %262 = vsyncadd [#allocation3], 4294967040 }
  0x36   :  { %263 = dma.done.wait [#allocation6], 528  }
  0x37   :  { %264 = vsyncadd [#allocation6], 4294966768  ;;  %v272_v0 = vmov 0.0   ;;  %vm273_vm0 = vmmov 0   ;;  %v58_v1 = vld [vmem:[#allocation5] sm:$0xff]  ;;  %v59_v2 = vld [vmem:[#allocation5 + $0x8] sm:$0xff] }
  0x38   :  { %157 = vmatprep.subr.bf16.mxu0 %v272_v0  ;;  %161 = vmatprep.mubr.msk.bf16.mxu0 %vm273_vm0, %v272_v0  ;;  %v60_v3 = vld [vmem:[#allocation5 + $0x10] sm:$0xff]  ;;  %v62_v4 = vpack.c.bf16 %v59_v2, %v58_v1  ;;  %v61_v5 = vld [vmem:[#allocation5 + $0x18] sm:$0xff]  ;;  %vm64_vm1 = vcmask 261120   ;;  %v153_v10 = vld [vmem:[#allocation7] ss:$0 sm:$0xff]  ;;  %s274_s2 = smov [#allocation8]  }
  0x39   :  { %v63_v6 = vpack.c.bf16 %v61_v5, %v60_v3  ;;  %v55_v7 = vld [vmem:[#allocation2] sm:$0xff]  ;;  %v56_v8 = vld [vmem:[#allocation2 + $0x8] sm:$0xff]  ;;  %s139_s22 = sshll.u32 %s274_s2, 4  ;;  %s140_s22 = int_to_ptr.vmem [resolvable:$true] %s139_s22 }
  0x3a   :  { %158 = vmatpush3.bf16.msra.mxu0 %v62_v4  ;;  %v57_v9 = vpack.c.bf16 %v56_v8, %v55_v7  ;;  %s239_s23 = scalar_lea.vmem %s140_s22, 256  ;;  %p244_p11 = scmp.lt.s32.totalorder %s140_s22, %s140_s22 }
  0x3b   :  { %159 = vmatprep.subr.bf16.mxu0 %v272_v0  ;;  %p240_p10 = scmp.ne.s32.totalorder %s140_s22, %s239_s23  ;;  %p245_p12 = scmp.lt.s32.totalorder %s239_s23, %s239_s23 }
  0x3d   :  { %p246_p13 = por %p245_p12, %p244_p11 }
  0x3e   :  { %160 = vmatpush3.bf16.msra.mxu0 %v63_v6 }
  0x3f   :  { %p247_p0 = pnand %p246_p13, %p240_p10 }
  0x41   :  { %162 = vmatmul.mubr.msk.bf16.vlgmr.msra.gmra.mrb[0].mxu0 %vm64_vm1, %v57_v9 }
 0x114   :  { %v102_v11 = vpop.f32.mrb[0].mxu0 }
 0x115   :  { %v120_v12 = vadd.f32 %v153_v10, %v102_v11  ;;  %v163_v13 = vpop.f32.mrb[1].mxu0 }
 0x116   :  { %v105_v14 = vpop.f32.mrb[2].mxu0 }
 0x117   :  { %122 = vst [vmem:[#allocation8] sm:$0xff] %v120_v12  ;;  %v121_v15 = vadd.f32 %v153_v10, %v105_v14  ;;  %v164_v16 = vpop.f32.mrb[3].mxu0 }
 0x119   :  { %123 = vst [vmem:[#allocation8 + $0x8] sm:$0xff] %v121_v15 }
 0x11a   :  { %250 = shalt.err (!%p247_p0)
}
 0x11b   :  { %s251_s28 = scalar_lea.hbm %s362_s3, 256 }
 0x11c   :  { %p252_p1 = scmp.ne.s32.totalorder %s362_s3, %s251_s28  ;;  %p255_p2 = scmp.lt.u32.totalorder %s251_s28, %s362_s3 }
 0x11e   :  { %p257_p3 = pnand %p255_p2, %p252_p1 }
 0x120   :  { %260 = shalt.err (!%p257_p3)
}
 0x121   :  { %145 = dma.vmem_to_hbm [thread:$0]  %s140_s22, 256, %s362_s3, [#allocation4], %s269_s24, %s269_s24, %s270_s25  }
 0x122   :  { %265 = dma.done.wait [#allocation4], 256  }
 0x123   :  { %266 = vsyncadd [#allocation4], 4294967040 }
 0x124   :  { %149 = vsyncpa [#allocation3], 1 }
 0x125   :  { %150 = vsyncpa [#allocation6], 1 }
 0x126   :  { %151 = vsyncpa [#allocation4], 1 }

</bundles_post_ra>
